<compile_context>
chip_gen: v7x
topology: tpu7x:2x2x1
jax: 0.10.0
libtpu: 0.0.40
codegen_flags: <defaults>
</compile_context>

<pallas_src>
import math
import functools

import jax
import jax.numpy as jnp
from jax.experimental import pallas as pl
from jax.experimental.pallas import tpu as pltpu


# ----------------------------------------------------------------------------
# Pallas kernel: fused MLP forward for one tile of tile_n points (lane axis).
# ----------------------------------------------------------------------------
def _mlp_kernel(x_ref, *refs, n_layers, chunk_n, unroll):
    """x_ref: (dim_in, tile_n) bf16; refs = (W0, b0, ..., WL, bL, o_ref)."""
    o_ref = refs[-1]                    # (dim_out, tile_n) f32
    p = refs[:-1]

    # Weights/biases are tiny (a few KiB total); load once, keep live.
    ws = [p[2 * l][...] for l in range(n_layers)]      # (out_l, in_l)  bf16
    bs = [p[2 * l + 1][...] for l in range(n_layers)]  # (out_l, 1)     f32

    # Hoisted bias broadcasts: one broadcast_in_dim per layer per grid step
    # instead of per chunk (JAX does not CSE broadcast_in_dim).
    bs_b = [jnp.broadcast_to(bs[l], (bs[l].shape[0], chunk_n))
            for l in range(n_layers)]

    tile_n = x_ref.shape[1]
    n_chunks = tile_n // chunk_n

    def body(c, carry):
        start = pl.multiple_of(c * chunk_n, chunk_n)   # chunk_n % 128 == 0
        h = x_ref[:, pl.ds(start, chunk_n)]            # (dim_in, chunk) bf16
        for l in range(n_layers):
            # (out, in) @ (in, chunk) -> (out, chunk); f32 accumulate on MXU.
            h = jnp.dot(ws[l], h, preferred_element_type=jnp.float32) + bs_b[l]
            if l < n_layers - 1:                       # hidden ReLU (f32)
                h = jnp.maximum(h, 0.0).astype(jnp.bfloat16)
        # output_activation: identity ('none' in this config).
        # TODO(synk): other get_activation() choices (sigmoid/trunc_exp/...)
        # would be one extra elementwise op here.
        o_ref[:, pl.ds(start, chunk_n)] = h.astype(o_ref.dtype)  # lane-dense
        return carry

    jax.lax.fori_loop(0, n_chunks, body, 0, unroll=unroll)


# ----------------------------------------------------------------------------
# Core wrapper: x already transposed & bf16 — (dim_in, N), points on lanes.
# Ragged N is handled by a cdiv grid (masked boundary writes); no padding pass.
# ----------------------------------------------------------------------------
def vanilla_mlp_forward_t(x_t, params, *, tile_n=32768, chunk_n=512):
    assert chunk_n % 128 == 0, "chunk_n must be lane aligned"
    assert tile_n % chunk_n == 0, "tile_n must be a multiple of chunk_n"

    dim_in, n = x_t.shape
    dim_out = params[-1][0].shape[0]
    n_layers = len(params)

    # Don't burn compute on a mostly-empty tile when N is small; keep tile_n a
    # multiple of chunk_n.  (For v7x, pick tile_n so n // tile_n >= 2.)
    tile_n = min(tile_n, ((n + chunk_n - 1) // chunk_n) * chunk_n)
    n_chunks = tile_n // chunk_n
    unroll = max(1, min(4, n_chunks))   # bounded unroll (avoid vreg spills)

    flat = []
    in_specs = [pl.BlockSpec((dim_in, tile_n), lambda i: (0, i))]
    for w, b in params:
        w16 = w.astype(jnp.bfloat16)                  # native (out, in) layout
        b2 = b.astype(jnp.float32).reshape(-1, 1)     # (out, 1)
        flat += [w16, b2]
        in_specs += [
            pl.BlockSpec(w16.shape, lambda i: (0, 0)),  # resident weight
            pl.BlockSpec(b2.shape, lambda i: (0, 0)),   # resident bias
        ]

    kernel = functools.partial(_mlp_kernel, n_layers=n_layers,
                               chunk_n=chunk_n, unroll=unroll)

    out_t = pl.pallas_call(
        kernel,
        out_shape=jax.ShapeDtypeStruct((dim_out, n), jnp.float32),
        grid_spec=pltpu.PrefetchScalarGridSpec(
            num_scalar_prefetch=0,
            grid=(pl.cdiv(n, tile_n),),
            in_specs=in_specs,
            out_specs=pl.BlockSpec((dim_out, tile_n), lambda i: (0, i)),
        ),
        compiler_params=pltpu.CompilerParams(
            dimension_semantics=("parallel",)),
    )(x_t, *flat)

    return out_t  # (dim_out, N)


# ----------------------------------------------------------------------------
# Convenience wrapper matching the PyTorch interface: x is (N, dim_in).
# Single fused cast(bf16)+transpose pass; no full-array pad/concatenate.
# ----------------------------------------------------------------------------
def vanilla_mlp_forward(x, params, *, tile_n=32768, chunk_n=512):
    # forward() casts to float; bf16 is then used only for the dot operands.
    x_t = x.astype(jnp.float32).astype(jnp.bfloat16).T      # (dim_in, N)
    out_t = vanilla_mlp_forward_t(x_t, params, tile_n=tile_n, chunk_n=chunk_n)
    # (dim_out, N) -> (N, dim_out); for dim_out=1 this transpose is free.
    return out_t.T


# ----------------------------------------------------------------------------
# Deterministic init mirroring VanillaMLP.make_linear (non-sphere_init branch):
# kaiming_uniform_(weight, nonlinearity='relu'), bias = 0.  Weights kept in
# PyTorch (out, in) orientation.
# TODO(synk): sphere_init (Softplus(beta=100) activation + geometric init) and
# weight_norm are not exercised by this config.
# ----------------------------------------------------------------------------
def init_vanilla_mlp_params(key, dim_in, dim_out, n_neurons, n_hidden_layers):
    dims = [dim_in] + [n_neurons] * n_hidden_layers + [dim_out]
    params = []
    for i in range(len(dims) - 1):
        d_in, d_out = dims[i], dims[i + 1]
        key, sub = jax.random.split(key)
        bound = math.sqrt(6.0 / d_in)   # kaiming_uniform_ with relu gain
        w = jax.random.uniform(sub, (d_out, d_in), jnp.float32, -bound, bound)
        b = jnp.zeros((d_out,), jnp.float32)
        params.append((w, b))
    return params


# ----------------------------------------------------------------------------
# Plain-JAX reference with identical bf16-operand / f32-accumulate math.
# ----------------------------------------------------------------------------
def reference_forward(x, params):
    h = x.astype(jnp.float32).astype(jnp.bfloat16)
    for i, (w, b) in enumerate(params):
        h = jnp.dot(h, w.astype(jnp.bfloat16).T,
                    preferred_element_type=jnp.float32) + b
        if i < len(params) - 1:
            h = jnp.maximum(h, 0.0).astype(jnp.bfloat16)
    return h  # identity output activation


if __name__ == "__main__":
    # Config consistent with the module: dim_in=3, dim_out=1, n_neurons=32,
    # n_hidden_layers=3, output_activation='none'.  Small demo N.
    dim_in, dim_out = 3, 1
    n_neurons, n_hidden_layers = 32, 3
    N = 2048

    key = jax.random.PRNGKey(0)
    kx, kp, kb = jax.random.split(key, 3)
    x = jax.random.normal(kx, (N, dim_in), jnp.float32)
    params = init_vanilla_mlp_params(kp, dim_in, dim_out, n_neurons,
                                     n_hidden_layers)
    # Module init zeroes biases; use small random biases here so the bias path
    # is actually exercised by the numeric check.
    params = [(w, 0.1 * jax.random.normal(jax.random.fold_in(kb, i),
                                          b.shape, jnp.float32))
              for i, (w, b) in enumerate(params)]

    # tile_n=1024 keeps grid length 2 at this small N (v7x megacore-friendly);
    # for production N (millions of points) use the default tile_n=32768.
    out = vanilla_mlp_forward(x, params, tile_n=1024, chunk_n=512)
    out = jax.block_until_ready(out)

    ref = reference_forward(x, params)
    assert out.shape == (N, dim_out)
    assert jnp.allclose(out, ref, atol=1e-3, rtol=1e-3), "mismatch vs reference"

    # Ragged-tail path (N not a multiple of tile_n): no padding pass, boundary
    # block handled by masked writes.
    N2 = 1000
    x2 = jax.random.normal(jax.random.fold_in(kx, 1), (N2, dim_in), jnp.float32)
    out2 = jax.block_until_ready(
        vanilla_mlp_forward(x2, params, tile_n=512, chunk_n=256))
    ref2 = reference_forward(x2, params)
    assert out2.shape == (N2, dim_out)
    assert jnp.allclose(out2, ref2, atol=1e-3, rtol=1e-3), "ragged mismatch"

    print("KERNEL_OK")
</pallas_src>

<mosaic_0001>
module attributes {stable_mosaic.version = 11 : i64} {
  func.func @_mlp_kernel(%arg0: i32, %arg1: memref<3x1024xbf16, #tpu.memory_space<vmem>>, %arg2: memref<32x3xbf16, #tpu.memory_space<vmem>>, %arg3: memref<32x1xf32, #tpu.memory_space<vmem>>, %arg4: memref<32x32xbf16, #tpu.memory_space<vmem>>, %arg5: memref<32x1xf32, #tpu.memory_space<vmem>>, %arg6: memref<32x32xbf16, #tpu.memory_space<vmem>>, %arg7: memref<32x1xf32, #tpu.memory_space<vmem>>, %arg8: memref<1x32xbf16, #tpu.memory_space<vmem>>, %arg9: memref<1x1xf32, #tpu.memory_space<vmem>>, %arg10: memref<1x1024xf32, #tpu.memory_space<vmem>>) attributes {dimension_semantics = [#tpu.dimension_semantics<parallel>], iteration_bounds = array<i64: 2>, scalar_prefetch = 0 : i64, scratch_operands = 0 : i64, tpu.core_type = #tpu.core_type<tc>, window_params = [{transform_indices = @transform_0, window_bounds = array<i64: 3, 1024>}, {pipeline_mode = #tpu.pipeline_mode<synchronous>, transform_indices = @transform_1, window_bounds = array<i64: 32, 3>}, {pipeline_mode = #tpu.pipeline_mode<synchronous>, transform_indices = @transform_2, window_bounds = array<i64: 32, 1>}, {pipeline_mode = #tpu.pipeline_mode<synchronous>, transform_indices = @transform_3, window_bounds = array<i64: 32, 32>}, {pipeline_mode = #tpu.pipeline_mode<synchronous>, transform_indices = @transform_4, window_bounds = array<i64: 32, 1>}, {pipeline_mode = #tpu.pipeline_mode<synchronous>, transform_indices = @transform_5, window_bounds = array<i64: 32, 32>}, {pipeline_mode = #tpu.pipeline_mode<synchronous>, transform_indices = @transform_6, window_bounds = array<i64: 32, 1>}, {pipeline_mode = #tpu.pipeline_mode<synchronous>, transform_indices = @transform_7, window_bounds = array<i64: 1, 32>}, {pipeline_mode = #tpu.pipeline_mode<synchronous>, transform_indices = @transform_8, window_bounds = array<i64: 1, 1>}, {transform_indices = @transform_9, window_bounds = array<i64: 1, 1024>}]} {
    %c0 = arith.constant 0 : index
    %c0_0 = arith.constant 0 : index
    %0 = vector.load %arg2[%c0, %c0_0] : memref<32x3xbf16, #tpu.memory_space<vmem>>, vector<32x3xbf16>
    %c0_1 = arith.constant 0 : index
    %c0_2 = arith.constant 0 : index
    %1 = vector.load %arg4[%c0_1, %c0_2] : memref<32x32xbf16, #tpu.memory_space<vmem>>, vector<32x32xbf16>
    %c0_3 = arith.constant 0 : index
    %c0_4 = arith.constant 0 : index
    %2 = vector.load %arg6[%c0_3, %c0_4] : memref<32x32xbf16, #tpu.memory_space<vmem>>, vector<32x32xbf16>
    %c0_5 = arith.constant 0 : index
    %c0_6 = arith.constant 0 : index
    %3 = vector.load %arg8[%c0_5, %c0_6] : memref<1x32xbf16, #tpu.memory_space<vmem>>, vector<1x32xbf16>
    %c0_7 = arith.constant 0 : index
    %c0_8 = arith.constant 0 : index
    %4 = vector.load %arg3[%c0_7, %c0_8] : memref<32x1xf32, #tpu.memory_space<vmem>>, vector<32x1xf32>
    %c0_9 = arith.constant 0 : index
    %c0_10 = arith.constant 0 : index
    %5 = vector.load %arg5[%c0_9, %c0_10] : memref<32x1xf32, #tpu.memory_space<vmem>>, vector<32x1xf32>
    %c0_11 = arith.constant 0 : index
    %c0_12 = arith.constant 0 : index
    %6 = vector.load %arg7[%c0_11, %c0_12] : memref<32x1xf32, #tpu.memory_space<vmem>>, vector<32x1xf32>
    %c0_13 = arith.constant 0 : index
    %c0_14 = arith.constant 0 : index
    %7 = vector.load %arg9[%c0_13, %c0_14] : memref<1x1xf32, #tpu.memory_space<vmem>>, vector<1x1xf32>
    %8 = vector.shape_cast %4 : vector<32x1xf32> to vector<32x1xf32>
    %9 = vector.broadcast %8 : vector<32x1xf32> to vector<32x512xf32>
    %10 = vector.shape_cast %5 : vector<32x1xf32> to vector<32x1xf32>
    %11 = vector.broadcast %10 : vector<32x1xf32> to vector<32x512xf32>
    %12 = vector.shape_cast %6 : vector<32x1xf32> to vector<32x1xf32>
    %13 = vector.broadcast %12 : vector<32x1xf32> to vector<32x512xf32>
    %14 = vector.shape_cast %7 : vector<1x1xf32> to vector<1x1xf32>
    %15 = vector.broadcast %14 : vector<1x1xf32> to vector<1x512xf32>
    %c0_i32 = arith.constant 0 : i32
    %c512_i32 = arith.constant 512 : i32
    %16 = arith.muli %c0_i32, %c512_i32 : i32
    %17 = tpu.assume_multiple %16, 512 : i32
    %c0_15 = arith.constant 0 : index
    %18 = arith.index_cast %17 : i32 to index
    %19 = vector.load %arg1[%c0_15, %18] : memref<3x1024xbf16, #tpu.memory_space<vmem>>, vector<3x512xbf16>
    %cst = arith.constant dense<0.000000e+00> : vector<32x512xf32>
    %20 = tpu.matmul %0, %19, %cst {dimension_numbers = #tpu.dot_dimension_numbers<[1], [0], [0], [1], [0, 0, 1, 1], [], []>} : vector<32x3xbf16>, vector<3x512xbf16>, vector<32x512xf32> -> vector<32x512xf32>
    %21 = arith.addf %20, %9 : vector<32x512xf32>
    %cst_16 = arith.constant 0.000000e+00 : f32
    %22 = vector.broadcast %cst_16 : f32 to vector<32x512xf32>
    %23 = arith.maximumf %21, %22 : vector<32x512xf32>
    %24 = arith.truncf %23 : vector<32x512xf32> to vector<32x512xbf16>
    %cst_17 = arith.constant dense<0.000000e+00> : vector<32x512xf32>
    %25 = tpu.matmul %1, %24, %cst_17 {dimension_numbers = #tpu.dot_dimension_numbers<[1], [0], [0], [1], [0, 0, 1, 1], [], []>} : vector<32x32xbf16>, vector<32x512xbf16>, vector<32x512xf32> -> vector<32x512xf32>
    %26 = arith.addf %25, %11 : vector<32x512xf32>
    %cst_18 = arith.constant 0.000000e+00 : f32
    %27 = vector.broadcast %cst_18 : f32 to vector<32x512xf32>
    %28 = arith.maximumf %26, %27 : vector<32x512xf32>
    %29 = arith.truncf %28 : vector<32x512xf32> to vector<32x512xbf16>
    %cst_19 = arith.constant dense<0.000000e+00> : vector<32x512xf32>
    %30 = tpu.matmul %2, %29, %cst_19 {dimension_numbers = #tpu.dot_dimension_numbers<[1], [0], [0], [1], [0, 0, 1, 1], [], []>} : vector<32x32xbf16>, vector<32x512xbf16>, vector<32x512xf32> -> vector<32x512xf32>
    %31 = arith.addf %30, %13 : vector<32x512xf32>
    %cst_20 = arith.constant 0.000000e+00 : f32
    %32 = vector.broadcast %cst_20 : f32 to vector<32x512xf32>
    %33 = arith.maximumf %31, %32 : vector<32x512xf32>
    %34 = arith.truncf %33 : vector<32x512xf32> to vector<32x512xbf16>
    %cst_21 = arith.constant dense<0.000000e+00> : vector<1x512xf32>
    %35 = tpu.matmul %3, %34, %cst_21 {dimension_numbers = #tpu.dot_dimension_numbers<[1], [0], [0], [1], [0, 0, 1, 1], [], []>} : vector<1x32xbf16>, vector<32x512xbf16>, vector<1x512xf32> -> vector<1x512xf32>
    %36 = arith.addf %35, %15 : vector<1x512xf32>
    %c0_22 = arith.constant 0 : index
    %37 = arith.index_cast %17 : i32 to index
    %38 = vector.load %arg10[%c0_22, %37] : memref<1x1024xf32, #tpu.memory_space<vmem>>, vector<1x512xf32>
    tpu.vector_store %arg10[%c0_22, %37], %36 {strides = array<i32>} : memref<1x1024xf32, #tpu.memory_space<vmem>>, vector<1x512xf32>,
    %c1_i32 = arith.constant 1 : i32
    %c512_i32_23 = arith.constant 512 : i32
    %39 = arith.muli %c1_i32, %c512_i32_23 : i32
    %40 = tpu.assume_multiple %39, 512 : i32
    %c0_24 = arith.constant 0 : index
    %41 = arith.index_cast %40 : i32 to index
    %42 = vector.load %arg1[%c0_24, %41] : memref<3x1024xbf16, #tpu.memory_space<vmem>>, vector<3x512xbf16>
    %cst_25 = arith.constant dense<0.000000e+00> : vector<32x512xf32>
    %43 = tpu.matmul %0, %42, %cst_25 {dimension_numbers = #tpu.dot_dimension_numbers<[1], [0], [0], [1], [0, 0, 1, 1], [], []>} : vector<32x3xbf16>, vector<3x512xbf16>, vector<32x512xf32> -> vector<32x512xf32>
    %44 = arith.addf %43, %9 : vector<32x512xf32>
    %cst_26 = arith.constant 0.000000e+00 : f32
    %45 = vector.broadcast %cst_26 : f32 to vector<32x512xf32>
    %46 = arith.maximumf %44, %45 : vector<32x512xf32>
    %47 = arith.truncf %46 : vector<32x512xf32> to vector<32x512xbf16>
    %cst_27 = arith.constant dense<0.000000e+00> : vector<32x512xf32>
    %48 = tpu.matmul %1, %47, %cst_27 {dimension_numbers = #tpu.dot_dimension_numbers<[1], [0], [0], [1], [0, 0, 1, 1], [], []>} : vector<32x32xbf16>, vector<32x512xbf16>, vector<32x512xf32> -> vector<32x512xf32>
    %49 = arith.addf %48, %11 : vector<32x512xf32>
    %cst_28 = arith.constant 0.000000e+00 : f32
    %50 = vector.broadcast %cst_28 : f32 to vector<32x512xf32>
    %51 = arith.maximumf %49, %50 : vector<32x512xf32>
    %52 = arith.truncf %51 : vector<32x512xf32> to vector<32x512xbf16>
    %cst_29 = arith.constant dense<0.000000e+00> : vector<32x512xf32>
    %53 = tpu.matmul %2, %52, %cst_29 {dimension_numbers = #tpu.dot_dimension_numbers<[1], [0], [0], [1], [0, 0, 1, 1], [], []>} : vector<32x32xbf16>, vector<32x512xbf16>, vector<32x512xf32> -> vector<32x512xf32>
    %54 = arith.addf %53, %13 : vector<32x512xf32>
    %cst_30 = arith.constant 0.000000e+00 : f32
    %55 = vector.broadcast %cst_30 : f32 to vector<32x512xf32>
    %56 = arith.maximumf %54, %55 : vector<32x512xf32>
    %57 = arith.truncf %56 : vector<32x512xf32> to vector<32x512xbf16>
    %cst_31 = arith.constant dense<0.000000e+00> : vector<1x512xf32>
    %58 = tpu.matmul %3, %57, %cst_31 {dimension_numbers = #tpu.dot_dimension_numbers<[1], [0], [0], [1], [0, 0, 1, 1], [], []>} : vector<1x32xbf16>, vector<32x512xbf16>, vector<1x512xf32> -> vector<1x512xf32>
    %59 = arith.addf %58, %15 : vector<1x512xf32>
    %c0_32 = arith.constant 0 : index
    %60 = arith.index_cast %40 : i32 to index
    %61 = vector.load %arg10[%c0_32, %60] : memref<1x1024xf32, #tpu.memory_space<vmem>>, vector<1x512xf32>
    tpu.vector_store %arg10[%c0_32, %60], %59 {strides = array<i32>} : memref<1x1024xf32, #tpu.memory_space<vmem>>, vector<1x512xf32>,
    %c2_i32 = arith.constant 2 : i32
    return
  }
  func.func @transform_0(%arg0: i32) -> (i32, i32) {
    %c0_i32 = arith.constant 0 : i32
    %c0_i32_0 = arith.constant 0 : i32
    return %c0_i32, %arg0 : i32, i32
  }
  func.func @transform_1(%arg0: i32) -> (i32, i32) {
    %c0_i32 = arith.constant 0 : i32
    %c0_i32_0 = arith.constant 0 : i32
    %c0_i32_1 = arith.constant 0 : i32
    return %c0_i32, %c0_i32_0 : i32, i32
  }
  func.func @transform_2(%arg0: i32) -> (i32, i32) {
    %c0_i32 = arith.constant 0 : i32
    %c0_i32_0 = arith.constant 0 : i32
    %c0_i32_1 = arith.constant 0 : i32
    return %c0_i32, %c0_i32_0 : i32, i32
  }
  func.func @transform_3(%arg0: i32) -> (i32, i32) {
    %c0_i32 = arith.constant 0 : i32
    %c0_i32_0 = arith.constant 0 : i32
    %c0_i32_1 = arith.constant 0 : i32
    return %c0_i32, %c0_i32_0 : i32, i32
  }
  func.func @transform_4(%arg0: i32) -> (i32, i32) {
    %c0_i32 = arith.constant 0 : i32
    %c0_i32_0 = arith.constant 0 : i32
    %c0_i32_1 = arith.constant 0 : i32
    return %c0_i32, %c0_i32_0 : i32, i32
  }
  func.func @transform_5(%arg0: i32) -> (i32, i32) {
    %c0_i32 = arith.constant 0 : i32
    %c0_i32_0 = arith.constant 0 : i32
    %c0_i32_1 = arith.constant 0 : i32
    return %c0_i32, %c0_i32_0 : i32, i32
  }
  func.func @transform_6(%arg0: i32) -> (i32, i32) {
    %c0_i32 = arith.constant 0 : i32
    %c0_i32_0 = arith.constant 0 : i32
    %c0_i32_1 = arith.constant 0 : i32
    return %c0_i32, %c0_i32_0 : i32, i32
  }
  func.func @transform_7(%arg0: i32) -> (i32, i32) {
    %c0_i32 = arith.constant 0 : i32
    %c0_i32_0 = arith.constant 0 : i32
    %c0_i32_1 = arith.constant 0 : i32
    return %c0_i32, %c0_i32_0 : i32, i32
  }
  func.func @transform_8(%arg0: i32) -> (i32, i32) {
    %c0_i32 = arith.constant 0 : i32
    %c0_i32_0 = arith.constant 0 : i32
    %c0_i32_1 = arith.constant 0 : i32
    return %c0_i32, %c0_i32_0 : i32, i32
  }
  func.func @transform_9(%arg0: i32) -> (i32, i32) {
    %c0_i32 = arith.constant 0 : i32
    %c0_i32_0 = arith.constant 0 : i32
    return %c0_i32, %arg0 : i32, i32
  }
}

</mosaic_0001>

<bundles_post_ra>
// kernel: tpu_custom_call.1
= control target key start
LH: loop header
LB: loop body
LE: loop exit
PB: predicated region body
PF: predicated region fallthrough
CT: control target
= control target key end

     0   :  { %s2297_s0 = inlined_call_operand.vmem [shape: bf16[3,2048], index: 0, kind: input, shape index: {}]   ;;  %s2298_s1 = inlined_call_operand.vmem [shape: bf16[32,3], index: 1, kind: input, shape index: {}]   ;;  %s2299_s2 = inlined_call_operand.vmem [shape: f32[32,1], index: 2, kind: input, shape index: {}]   ;;  %s2300_s3 = inlined_call_operand.vmem [shape: bf16[32,32], index: 3, kind: input, shape index: {}]   ;;  %s2301_s4 = inlined_call_operand.vmem [shape: f32[32,1], index: 4, kind: input, shape index: {}]   ;;  %s2302_s5 = inlined_call_operand.vmem [shape: bf16[32,32], index: 5, kind: input, shape index: {}]   ;;  %s2303_s6 = inlined_call_operand.vmem [shape: f32[32,1], index: 6, kind: input, shape index: {}]   ;;  %s2304_s7 = inlined_call_operand.vmem [shape: bf16[1,32], index: 7, kind: input, shape index: {}]   ;;  %s2305_s8 = inlined_call_operand.<no memory space> [shape: f32[1,1], index: 8, kind: input, shape index: {}]   ;;  %s2306_s9 = inlined_call_operand.hbm [shape: f32[1,2048], index: 9, kind: output, shape index: {}]  }
   0x1   :  { %v14_v0 = vstv %s2305_s8 }
   0x2   :  { %15 = vst [vmem:[#allocation2] sm:$0x1] %v14_v0 }
   0x3   :  { %16 = vsyncpa [#allocation4], 0 }
   0x4   :  { %18 = vsyncpa [#allocation4 + $0x1], 0  ;;  %s1859_s11 = smov 0   ;;  %s1861_s12 = smov 0  }
   0x5   :  { %s1863_s13 = smov 0   ;;  %s1865_s14 = smov 0  }
   0x6 LB: > { %s1880_s8 = sadd.s32 4294967295, %s1799_s14   ;;  %s1635_s15 = sadd.s32 4294967294, %s1799_s14   ;;  %s1799_s14 = sphi %s1865_s14, %s2314_s14   ;;  %s1795_s13 = sphi %s1863_s13, %s2313_s13   ;;  %s1791_s12 = sphi %s1861_s12, %s2312_s12   ;;  %s1787_s11 = sphi %s1859_s11, %s2311_s11  }
   0x7   : > { %s1884_s16 = sadd.s32 1, %s1799_s14   ;;  %s225_s17 = sadd.s32 1, %s1795_s13 }
   0x8   : > { %s222_s18 = ssub.s32 %s1799_s14, %s1884_s16  ;;  %p235_p0 = scmp.ne.s32.totalorder %s1795_s13, %s1791_s12 }
   0x9   : > { %p223_p1 = scmp.eq.s32.totalorder %s222_s18, 0  ;;  %p236_p2 = scmp.eq.s32.totalorder %s1880_s8, 1 }
   0xa   : > { %p241_p3 = scmp.ne.s32.totalorder %s1791_s12, %s1787_s11  ;;  %p242_p4 = scmp.eq.s32.totalorder %s1635_s15, 1 }
   0xb   : > { %s1895_s19 = scalar_select %p223_p1, %s1795_s13, %s225_s17  }
   0xc   : > { %p1897_p5 = por %p236_p2, %p235_p0  ;;  %p1901_p6 = por %p242_p4, %p241_p3 }
   0xd   : > { %p1638_p7 = scmp.ge.s32.totalorder %s1799_s14, 1  ;;  %p293_p8 = scmp.lt.s32.totalorder %s1799_s14, 3 }
   0xf   : > { %p294_p9 = pnand %p1638_p7, %p293_p8 }
  0x10   : > { %s1640_s22 = sshll.u32 (!%p294_p9), %s1880_s8, 3  ;;  %v428_v1 = vlaneseq (!%p294_p9)  ;;  %v1801_v2 = vmov (!%p294_p9), 1983009808   ;;  %vm468_vm0 = vcmask (!%p294_p9), 1040384   ;;  %v1802_v5 = vmov (!%p294_p9), 0   ;;  %v350_v7 = vld [vmem:[%s2299_s2] sm:$0xff] (!%p294_p9) }
  0x11   : > { %297 = sbr.rel (%p294_p9) target bundleno = 1683 (0x693), region = 56  ;;  %p330_p10 = scmp.lt.s32.totalorder (!%p294_p9), %s1640_s22, 15  ;;  %v446_v3 = vunpack.c.l.s4 (!%p294_p9), %v1801_v2  ;;  %516 = vmatprep.mubr.bf16.mxu0 (!%p294_p9), %v1802_v5  ;;  %569 = vmatprep.mubr.bf16.mxu1 (!%p294_p9), %v1802_v5  ;;  %vm469_vm1 = vcmask (!%p294_p9), 1041408   ;;  %v1803_v9 = vmov (!%p294_p9), 65535   ;;  %v351_v11 = vld [vmem:[%s2299_s2 + $0x8] sm:$0xff] (!%p294_p9)  ;;  %v352_v12 = vld [vmem:[%s2299_s2 + $0x10] sm:$0xff] (!%p294_p9) }
  0x12   : > { %v1909_v4 = vshrl.u32 (!%p294_p9), %v428_v1, 7  ;;  %1727 = vset.pattern.permute.xlu0 (!%p294_p9), %v1802_v5  ;;  %1728 = vset.pattern.permute.xlu1 (!%p294_p9), %v1802_v5  ;;  %v470_v10 = vsel (!%p294_p9), %vm468_vm0, 4294967295, %v1803_v9  ;;  %v353_v14 = vld [vmem:[%s2299_s2 + $0x18] sm:$0xff] (!%p294_p9)  ;;  %v354_v18 = vld [vmem:[%s2301_s4] sm:$0xff] (!%p294_p9)  ;;  %v355_v22 = vld [vmem:[%s2301_s4 + $0x8] sm:$0xff] (!%p294_p9)  ;;  %vm461_vm2 = vcmask (!%p294_p9), 23552  }
  0x13   : > { %v447_v6 = vunpack.c.0.s8 (!%p294_p9), %v446_v3  ;;  %365 = vperm.xlu0 (!%p294_p9), %1727, %v350_v7   ;;  %375 = vperm.xlu1 (!%p294_p9), %1728, %v352_v12   ;;  %v1937_v16 = vsel (!%p294_p9), %vm469_vm1, %v470_v10, 0  ;;  %v356_v26 = vld [vmem:[%s2301_s4 + $0x10] sm:$0xff] (!%p294_p9)  ;;  %v1956_v28 = vld [vmem:[%s2298_s1] sm:$0xff] (!%p294_p9)   ;;  %v357_v29 = vld [vmem:[%s2301_s4 + $0x18] sm:$0xff] (!%p294_p9)  ;;  %vm624_vm3 = vcmask (!%p294_p9), 261120   ;;  %s326_s27 = sand.u32 (!%p294_p9), 1, %s1791_s12  }
  0x14   : > { %v358_v30 = vld [vmem:[%s2303_s6] sm:$0xff] (!%p294_p9)  ;;  %v359_v31 = vld [vmem:[%s2303_s6 + $0x8] sm:$0xff] (!%p294_p9)  ;;  %v360_v32 = vld [vmem:[%s2303_s6 + $0x10] sm:$0xff] (!%p294_p9)  ;;  %s1639_s28 = sshll.u32 (!%p294_p9), %s326_s27, 3  ;;  %vm2156_vm4 = vcmp.lt.s32.totalorder (!%p294_p9), %v428_v1, 512  ;;  %s1683_s30 = sshll.u32 (!%p294_p9), %s1880_s8, 7 }
  0x15   : > { %v1919_v8 = vsub.s32 (!%p294_p9), %v447_v6, %v1909_v4  ;;  %v1979_v33 = vld [vmem:[%s2298_s1 + $0x8] sm:$0xff] (!%p294_p9)   ;;  %v361_v34 = vld [vmem:[%s2303_s6 + $0x18] sm:$0xff] (!%p294_p9)  ;;  %v362_v35 = vld [vmem:[#allocation2] sm:$0x1] (!%p294_p9)  ;;  %s2165_s29 = scalar_lea.vmem (!%p294_p9), [#allocation3], %s1639_s28  ;;  %s1562_s23 = scalar_lea.sflag (!%p294_p9), [#allocation4], %s326_s27 }
  0x16   : > { %s1576_s10 = sshll.u32 (!%p294_p9), %s2165_s29, 4  ;;  %s1805_s24 = smov (!%p294_p9), [#allocation3]   ;;  %s2252_s10 = int_to_ptr.vmem [resolvable:$true] %s1576_s10 }
  0x17   : > { %370 = vperm.xlu0 (!%p294_p9), %1727, %v351_v11   ;;  %380 = vperm.xlu1 (!%p294_p9), %1728, %v353_v14   ;;  %s1737_s8 = scalar_lea.vmem (!%p294_p9), %s2252_s10, 128 }
  0x18   : > { %s2316_s22 = smov (!%p330_p10, %s1640_s22), 15  ;;  %p1738_p11 = scmp.ne.s32.totalorder %s2252_s10, %s1737_s8 }
  0x19   : > { %s1641_s25 = sshll.u32 %s2316_s22, 1  ;;  %s2250_s22 = scalar_lea.hbm %s2306_s9, %s1683_s30 }
  0x1a   : > { %s1930_s15 = scalar_lea.vmem %s2297_s0, %s1641_s25  ;;  %p1739_p12 = pnand %p1738_p11, %p1897_p5 }
  0x1b   : > { %v432_v13 = vld [vmem:[%s1930_s15] sm:$0xff]  ;;  %385 = vperm.xlu0 %1727, %v354_v18   ;;  %390 = vperm.xlu1 %1728, %v355_v22   ;;  %s1741_s25 = sshll.u32 %s1805_s24, 4  ;;  %s1742_s25 = int_to_ptr.vmem [resolvable:$false] %s1741_s25 }
  0x1c   : > { %v451_v15 = vrot.slane %v432_v13, %v1919_v8  ;;  %v444_v17 = vcombine.high %v432_v13, %v432_v13  ;;  %p1740_p13 = pneg %p1739_p12  ;;  %p1744_p0 = scmp.lt.s32.totalorder %s2252_s10, %s1742_s25 }
  0x1e   : > { %v459_v19 = vcombine.high %v451_v15, %v451_v15  ;;  %v458_v20 = vrot.slane %v444_v17, %v1919_v8  ;;  %v473_v21 = vand.u32 %v1937_v16, %v451_v15 }
  0x1f   : > { %395 = vperm.xlu0 %1727, %v356_v26   ;;  %400 = vperm.xlu1 %1728, %v357_v29  }
  0x20   : > { %v476_v23 = vand.u32 %v1937_v16, %v459_v19  ;;  %v460_v24 = vcombine.high %v458_v20, %v458_v20  ;;  %v479_v25 = vand.u32 %v1937_v16, %v458_v20 }
  0x22   : > { %484 = vmatprep.subr.bf16.mxu0 %v476_v23  ;;  %v482_v27 = vand.u32 %v1937_v16, %v460_v24 }
  0x23   : > { %485 = vmatpush1.bf16.msra.mxu0 %v473_v21  ;;  %405 = vperm.xlu0 %1727, %v358_v30  }
  0x24   : > { %537 = vmatprep.subr.bf16.mxu1 %v482_v27  ;;  %410 = vperm.xlu1 %1728, %v359_v31  }
  0x25   : > { %538 = vmatpush1.bf16.msra.mxu1 %v479_v25 }
  0x26   : > { %1644 = vmatmul.mubr.msk.bf16.vlgmr.msra.gmra.mrb[0].mxu0 %vm461_vm2, %v1956_v28 }
  0x27   : > { %526 = vmatprep.mubr.bf16.mxu0 %v1802_v5  ;;  %415 = vperm.xlu0 %1727, %v360_v32  }
  0x28   : > { %1646 = vmatmul.mubr.msk.bf16.vlgmr.msra.gmra.mrb[0].mxu1 %vm461_vm2, %v1956_v28  ;;  %420 = vperm.xlu1 %1728, %v361_v34  }
  0x29   : > { %579 = vmatprep.mubr.bf16.mxu1 %v1802_v5 }
  0x2b   : > { %425 = vperm.xlu0 %1727, %v362_v35  }
  0x2e   : > { %1645 = vmatmul.mubr.msk.bf16.gmra.mrb[4].mxu0 %vm461_vm2, %v1979_v33 }
  0x2f   : > { %663 = vmatprep.mubr.bf16.mxu0 %v1802_v5 }
  0x30   : > { %1647 = vmatmul.mubr.msk.bf16.gmra.mrb[4].mxu1 %vm461_vm2, %v1979_v33 }
  0x31   : > { %716 = vmatprep.mubr.bf16.mxu1 %v1802_v5 }
  0x92   : > { %v1990_v36 = vpop.permute.xlu0 %365  ;;  %v1992_v37 = vpop.permute.xlu1 %375 }
  0x96   : > { %v1994_v39 = vpop.permute.xlu0 %370  ;;  %v2004_v3 = vpop.permute.xlu1 %380 }
  0xf9   : > { %v518_v38 = vpop.f32.mrb[0].mxu0 }
  0xfa   : > { %v519_v40 = vadd.f32 %v518_v38, %v1990_v36  ;;  %v520_v41 = vpop.f32.mrb[1].mxu0 }
  0xfb   : > { %v521_v42 = vadd.f32 %v520_v41, %v1990_v36  ;;  %v522_v43 = vpop.f32.mrb[2].mxu0  ;;  %v571_v44 = vpop.f32.mrb[0].mxu1 }
  0xfc   : > { %v590_v45 = vmax.f32 %v519_v40, 0.0  ;;  %v523_v46 = vadd.f32 %v522_v43, %v1994_v39  ;;  %v572_v47 = vadd.f32 %v571_v44, %v1990_v36  ;;  %v524_v48 = vpop.f32.mrb[3].mxu0  ;;  %v573_v49 = vpop.f32.mrb[1].mxu1  ;;  %v2028_v43 = vld [vmem:[%s2300_s3 + $0x8] sm:$0xff]  }
  0xfd   : > { %v591_v50 = vmax.f32 %v521_v42, 0.0  ;;  %v525_v51 = vadd.f32 %v524_v48, %v1994_v39  ;;  %v574_v52 = vadd.f32 %v573_v49, %v1990_v36  ;;  %v575_v53 = vpop.f32.mrb[2].mxu1  ;;  %v2017_v42 = vld [vmem:[%s2300_s3] sm:$0xff]   ;;  %v2036_v44 = vpop.permute.xlu0 %385 }
  0xfe   : > { %v594_v54 = vmax.f32 %v523_v46, 0.0  ;;  %v576_v55 = vadd.f32 %v575_v53, %v1994_v39  ;;  %v577_v56 = vpop.f32.mrb[3].mxu1  ;;  %v592_v60 = vmax.f32 %v572_v47, 0.0  ;;  %v2038_v46 = vpop.permute.xlu1 %390 }
  0xff   : > { %v595_v57 = vmax.f32 %v525_v51, 0.0  ;;  %v578_v58 = vadd.f32 %v577_v56, %v1994_v39  ;;  %v593_v63 = vmax.f32 %v574_v52, 0.0 }
 0x100   : > { %v606_v59 = vpack.c.bf16 %v594_v54, %v590_v45  ;;  %v596_v61 = vmax.f32 %v576_v55, 0.0 }
 0x101   : > { %v607_v62 = vpack.c.bf16 %v595_v57, %v591_v50  ;;  %v597_v0 = vmax.f32 %v578_v58, 0.0  ;;  %v528_v2 = vpop.f32.mrb[4].mxu0 }
 0x102   : > { %v608_v6 = vpack.c.bf16 %v596_v61, %v592_v60  ;;  %v529_v7 = vadd.f32 %v528_v2, %v1992_v37  ;;  %v530_v9 = vpop.f32.mrb[5].mxu0 }
 0x103   : > { %v609_v10 = vpack.c.bf16 %v597_v0, %v593_v63  ;;  %v531_v11 = vadd.f32 %v530_v9, %v1992_v37  ;;  %v532_v12 = vpop.f32.mrb[6].mxu0  ;;  %v581_v13 = vpop.f32.mrb[4].mxu1  ;;  %631 = vmatprep.subr.bf16.mxu0 %v607_v62 }
 0x104   : > { %v598_v14 = vmax.f32 %v529_v7, 0.0  ;;  %v533_v15 = vadd.f32 %v532_v12, %v2004_v3  ;;  %v582_v17 = vadd.f32 %v581_v13, %v1992_v37  ;;  %v534_v18 = vpop.f32.mrb[7].mxu0  ;;  %v583_v19 = vpop.f32.mrb[5].mxu1  ;;  %632 = vmatpush1.bf16.msra.mxu0 %v606_v59 }
 0x105   : > { %v535_v20 = vadd.f32 %v534_v18, %v2004_v3  ;;  %v584_v21 = vadd.f32 %v583_v19, %v1992_v37  ;;  %v585_v22 = vpop.f32.mrb[6].mxu1  ;;  %684 = vmatprep.subr.bf16.mxu1 %v609_v10  ;;  %v599_v26 = vmax.f32 %v531_v11, 0.0  ;;  %v2048_v10 = vpop.permute.xlu0 %395 }
 0x106   : > { %v602_v23 = vmax.f32 %v533_v15, 0.0  ;;  %v586_v24 = vadd.f32 %v585_v22, %v2004_v3  ;;  %v587_v25 = vpop.f32.mrb[7].mxu1  ;;  %685 = vmatpush1.bf16.msra.mxu1 %v608_v6  ;;  %v600_v31 = vmax.f32 %v582_v17, 0.0  ;;  %v2050_v15 = vpop.permute.xlu1 %400 }
 0x107   : > { %v603_v27 = vmax.f32 %v535_v20, 0.0  ;;  %v588_v29 = vadd.f32 %v587_v25, %v2004_v3  ;;  %v601_v35 = vmax.f32 %v584_v21, 0.0 }
 0x108   : > { %v610_v30 = vpack.c.bf16 %v602_v23, %v598_v14  ;;  %v604_v32 = vmax.f32 %v586_v24, 0.0 }
 0x109   : > { %v611_v34 = vpack.c.bf16 %v603_v27, %v599_v26  ;;  %v605_v38 = vmax.f32 %v588_v29, 0.0 }
 0x10a   : > { %v612_v40 = vpack.c.bf16 %v604_v32, %v600_v31 }
 0x10b   : > { %v613_v41 = vpack.c.bf16 %v605_v38, %v601_v35  ;;  %633 = vmatprep.subr.bf16.mxu0 %v611_v34 }
 0x10c   : > { %634 = vmatpush1.bf16.msra.mxu0 %v610_v30 }
 0x10d   : > { %686 = vmatprep.subr.bf16.mxu1 %v613_v41 }
 0x10e   : > { %687 = vmatpush1.bf16.msra.mxu1 %v612_v40 }
 0x10f   : > { %1650 = vmatmul.mubr.msk.bf16.vlgmr.msra.gmra.mrb[8].mxu0 %vm624_vm3, %v2017_v42 }
 0x110   : > { %673 = vmatprep.mubr.bf16.mxu0 %v1802_v5 }
 0x111   : > { %1652 = vmatmul.mubr.msk.bf16.vlgmr.msra.gmra.mrb[8].mxu1 %vm624_vm3, %v2017_v42 }
 0x112   : > { %726 = vmatprep.mubr.bf16.mxu1 %v1802_v5 }
 0x117   : > { %1651 = vmatmul.mubr.msk.bf16.gmra.mrb[12].mxu0 %vm624_vm3, %v2028_v43 }
 0x118   : > { %809 = vmatprep.mubr.bf16.mxu0 %v1802_v5 }
 0x119   : > { %1653 = vmatmul.mubr.msk.bf16.gmra.mrb[12].mxu1 %vm624_vm3, %v2028_v43 }
 0x11a   : > { %862 = vmatprep.mubr.bf16.mxu1 %v1802_v5 }
 0x1e2   : > { %v665_v45 = vpop.f32.mrb[8].mxu0 }
 0x1e3   : > { %v666_v47 = vadd.f32 %v665_v45, %v2036_v44  ;;  %v667_v48 = vpop.f32.mrb[9].mxu0 }
 0x1e4   : > { %v668_v49 = vadd.f32 %v667_v48, %v2036_v44  ;;  %v669_v50 = vpop.f32.mrb[10].mxu0  ;;  %v718_v51 = vpop.f32.mrb[8].mxu1 }
 0x1e5   : > { %v670_v52 = vadd.f32 %v669_v50, %v2038_v46  ;;  %v719_v53 = vadd.f32 %v718_v51, %v2036_v44  ;;  %v671_v54 = vpop.f32.mrb[11].mxu0  ;;  %v720_v55 = vpop.f32.mrb[9].mxu1  ;;  %v737_v59 = vmax.f32 %v666_v47, 0.0 }
 0x1e6   : > { %v672_v56 = vadd.f32 %v671_v54, %v2038_v46  ;;  %v721_v57 = vadd.f32 %v720_v55, %v2036_v44  ;;  %v722_v58 = vpop.f32.mrb[10].mxu1  ;;  %v738_v63 = vmax.f32 %v668_v49, 0.0  ;;  %v2063_v55 = vld [vmem:[%s2302_s5] sm:$0xff]  }
 0x1e7   : > { %v741_v60 = vmax.f32 %v670_v52, 0.0  ;;  %v723_v61 = vadd.f32 %v722_v58, %v2038_v46  ;;  %v724_v62 = vpop.f32.mrb[11].mxu1  ;;  %v739_v7 = vmax.f32 %v719_v53, 0.0 }
 0x1e8   : > { %v742_v0 = vmax.f32 %v672_v56, 0.0  ;;  %v725_v2 = vadd.f32 %v724_v62, %v2038_v46  ;;  %v740_v12 = vmax.f32 %v721_v57, 0.0  ;;  %v2074_v56 = vld [vmem:[%s2302_s5 + $0x8] sm:$0xff]   ;;  %v2082_v57 = vpop.permute.xlu0 %405 }
 0x1e9   : > { %v753_v6 = vpack.c.bf16 %v741_v60, %v737_v59  ;;  %v743_v9 = vmax.f32 %v723_v61, 0.0  ;;  %v2084_v59 = vpop.permute.xlu1 %410 }
 0x1ea   : > { %v754_v11 = vpack.c.bf16 %v742_v0, %v738_v63  ;;  %v744_v13 = vmax.f32 %v725_v2, 0.0  ;;  %v675_v14 = vpop.f32.mrb[12].mxu0  ;;  %v1662_v2 = vld [vmem:[%s1930_s15 + $0x8] sm:$0xff]  ;;  %s1743_s15 = scalar_lea.vmem %s1742_s25, 256 }
 0x1eb   : > { %v755_v17 = vpack.c.bf16 %v743_v9, %v739_v7  ;;  %v676_v18 = vadd.f32 %v675_v14, %v2048_v10  ;;  %v677_v19 = vpop.f32.mrb[13].mxu0  ;;  %p1745_p1 = scmp.lt.s32.totalorder %s1743_s15, %s1737_s8 }
 0x1ec   : > { %v756_v20 = vpack.c.bf16 %v744_v13, %v740_v12  ;;  %v678_v21 = vadd.f32 %v677_v19, %v2048_v10  ;;  %v679_v22 = vpop.f32.mrb[14].mxu0  ;;  %v728_v23 = vpop.f32.mrb[12].mxu1  ;;  %777 = vmatprep.subr.bf16.mxu0 %v754_v11 }
 0x1ed   : > { %v680_v24 = vadd.f32 %v679_v22, %v2050_v15  ;;  %v729_v25 = vadd.f32 %v728_v23, %v2048_v10  ;;  %v681_v26 = vpop.f32.mrb[15].mxu0  ;;  %v730_v27 = vpop.f32.mrb[13].mxu1  ;;  %778 = vmatpush1.bf16.msra.mxu0 %v753_v6  ;;  %v745_v32 = vmax.f32 %v676_v18, 0.0  ;;  %p1746_p2 = por %p1745_p1, %p1744_p0 }
 0x1ee   : > { %v682_v29 = vadd.f32 %v681_v26, %v2050_v15  ;;  %v731_v30 = vadd.f32 %v730_v27, %v2048_v10  ;;  %v732_v31 = vpop.f32.mrb[14].mxu1  ;;  %830 = vmatprep.subr.bf16.mxu1 %v756_v20  ;;  %v746_v40 = vmax.f32 %v678_v21, 0.0  ;;  %v1029_v21 = vcombine.high %v1662_v2, %v1662_v2 }
 0x1ef   : > { %v749_v34 = vmax.f32 %v680_v24, 0.0  ;;  %v733_v35 = vadd.f32 %v732_v31, %v2050_v15  ;;  %v734_v38 = vpop.f32.mrb[15].mxu1  ;;  %831 = vmatpush1.bf16.msra.mxu1 %v755_v17  ;;  %v747_v48 = vmax.f32 %v729_v25, 0.0  ;;  %p1747_p3 = pnand %p1746_p2, %p1740_p13 }
 0x1f0   : > { %v750_v41 = vmax.f32 %v682_v29, 0.0  ;;  %v735_v45 = vadd.f32 %v734_v38, %v2050_v15  ;;  %v748_v51 = vmax.f32 %v731_v30, 0.0  ;;  %v2095_v29 = vpop.permute.xlu0 %415  ;;  %v2098_v38 = vpop.permute.xlu1 %420 }
 0x1f1   : > { %v757_v47 = vpack.c.bf16 %v749_v34, %v745_v32  ;;  %v751_v49 = vmax.f32 %v733_v35, 0.0  ;;  %v1036_v35 = vrot.slane %v1662_v2, %v1919_v8 }
 0x1f2   : > { %v758_v50 = vpack.c.bf16 %v750_v41, %v746_v40  ;;  %v752_v52 = vmax.f32 %v735_v45, 0.0 }
 0x1f3   : > { %v759_v53 = vpack.c.bf16 %v751_v49, %v747_v48 }
 0x1f4   : > { %v760_v54 = vpack.c.bf16 %v752_v52, %v748_v51  ;;  %779 = vmatprep.subr.bf16.mxu0 %v758_v50  ;;  %v1043_v51 = vrot.slane %v1029_v21, %v1919_v8 }
 0x1f5   : > { %780 = vmatpush1.bf16.msra.mxu0 %v757_v47 }
 0x1f6   : > { %832 = vmatprep.subr.bf16.mxu1 %v760_v54 }
 0x1f7   : > { %833 = vmatpush1.bf16.msra.mxu1 %v759_v53 }
 0x1f8   : > { %1656 = vmatmul.mubr.msk.bf16.vlgmr.msra.gmra.mrb[16].mxu0 %vm624_vm3, %v2063_v55 }
 0x1f9   : > { %819 = vmatprep.mubr.bf16.mxu0 %v1802_v5 }
 0x1fa   : > { %1658 = vmatmul.mubr.msk.bf16.vlgmr.msra.gmra.mrb[16].mxu1 %vm624_vm3, %v2063_v55 }
 0x1fb   : > { %872 = vmatprep.mubr.bf16.mxu1 %v1802_v5 }
 0x200   : > { %1657 = vmatmul.mubr.msk.bf16.gmra.mrb[20].mxu0 %vm624_vm3, %v2074_v56 }
 0x201   : > { %942 = vmatprep.mubr.bf16.mxu0 %v1802_v5 }
 0x202   : > { %1659 = vmatmul.mubr.msk.bf16.gmra.mrb[20].mxu1 %vm624_vm3, %v2074_v56 }
 0x203   : > { %983 = vmatprep.mubr.bf16.mxu1 %v1802_v5 }
 0x2cb   : > { %v811_v58 = vpop.f32.mrb[16].mxu0 }
 0x2cc   : > { %v812_v60 = vadd.f32 %v811_v58, %v2082_v57  ;;  %v813_v61 = vpop.f32.mrb[17].mxu0 }
 0x2cd   : > { %v814_v62 = vadd.f32 %v813_v61, %v2082_v57  ;;  %v815_v63 = vpop.f32.mrb[18].mxu0  ;;  %v864_v0 = vpop.f32.mrb[16].mxu1 }
 0x2ce   : > { %v816_v6 = vadd.f32 %v815_v63, %v2084_v59  ;;  %v865_v7 = vadd.f32 %v864_v0, %v2082_v57  ;;  %v817_v9 = vpop.f32.mrb[19].mxu0  ;;  %v866_v11 = vpop.f32.mrb[17].mxu1  ;;  %v883_v17 = vmax.f32 %v812_v60, 0.0  ;;  %v1044_v63 = vcombine.high %v1036_v35, %v1036_v35 }
 0x2cf   : > { %v818_v12 = vadd.f32 %v817_v9, %v2084_v59  ;;  %v867_v13 = vadd.f32 %v866_v11, %v2082_v57  ;;  %v868_v14 = vpop.f32.mrb[18].mxu1  ;;  %v884_v22 = vmax.f32 %v814_v62, 0.0 }
 0x2d0   : > { %v887_v18 = vmax.f32 %v816_v6, 0.0  ;;  %v869_v19 = vadd.f32 %v868_v14, %v2084_v59  ;;  %v870_v20 = vpop.f32.mrb[19].mxu1  ;;  %v885_v26 = vmax.f32 %v865_v7, 0.0  ;;  %v1050_v21 = vand.u32 %v1044_v63, %v1937_v16 }
 0x2d1   : > { %v888_v23 = vmax.f32 %v818_v12, 0.0  ;;  %v871_v24 = vadd.f32 %v870_v20, %v2084_v59  ;;  %v886_v31 = vmax.f32 %v867_v13, 0.0  ;;  %v1045_v12 = vcombine.high %v1043_v51, %v1043_v51 }
 0x2d2   : > { %v899_v25 = vpack.c.bf16 %v887_v18, %v883_v17  ;;  %v889_v27 = vmax.f32 %v869_v19, 0.0 }
 0x2d3   : > { %v900_v30 = vpack.c.bf16 %v888_v23, %v884_v22  ;;  %v890_v32 = vmax.f32 %v871_v24, 0.0  ;;  %v821_v34 = vpop.f32.mrb[20].mxu0  ;;  %v1056_v24 = vand.u32 %v1045_v12, %v1937_v16 }
 0x2d4   : > { %v901_v40 = vpack.c.bf16 %v889_v27, %v885_v26  ;;  %v822_v41 = vadd.f32 %v821_v34, %v2095_v29  ;;  %v823_v45 = vpop.f32.mrb[21].mxu0  ;;  %v1047_v26 = vand.u32 %v1036_v35, %v1937_v16  ;;  %v1053_v27 = vand.u32 %v1043_v51, %v1937_v16 }
 0x2d5   : > { %v902_v47 = vpack.c.bf16 %v890_v32, %v886_v31  ;;  %v824_v48 = vadd.f32 %v823_v45, %v2095_v29  ;;  %v825_v49 = vpop.f32.mrb[22].mxu0  ;;  %v874_v50 = vpop.f32.mrb[20].mxu1  ;;  %910 = vmatprep.subr.bf16.mxu0 %v900_v30  ;;  %v430_v16 = vsub.s32 0, %v1909_v4  ;;  %v1804_v30 = vmov 1966171168  }
 0x2d6   : > { %v826_v52 = vadd.f32 %v825_v49, %v2098_v38  ;;  %v875_v53 = vadd.f32 %v874_v50, %v2095_v29  ;;  %v827_v54 = vpop.f32.mrb[23].mxu0  ;;  %v876_v58 = vpop.f32.mrb[21].mxu1  ;;  %911 = vmatpush1.bf16.msra.mxu0 %v899_v25  ;;  %v891_v0 = vmax.f32 %v822_v41, 0.0  ;;  %v2114_v25 = vld [vmem:[%s2304_s7] sm:$0x1]  ;;  %v999_v31 = vunpack.c.l.s4 %v1804_v30 }
 0x2d7   : > { %v828_v60 = vadd.f32 %v827_v54, %v2098_v38  ;;  %v877_v61 = vadd.f32 %v876_v58, %v2095_v29  ;;  %v878_v62 = vpop.f32.mrb[22].mxu1  ;;  %951 = vmatprep.subr.bf16.mxu1 %v902_v47  ;;  %v892_v8 = vmax.f32 %v824_v48, 0.0  ;;  %v426_v32 = vpop.permute.xlu0 %425 }
 0x2d8   : > { %v895_v2 = vmax.f32 %v826_v52, 0.0  ;;  %v879_v6 = vadd.f32 %v878_v62, %v2098_v38  ;;  %v880_v7 = vpop.f32.mrb[23].mxu1  ;;  %952 = vmatpush1.bf16.msra.mxu1 %v901_v40  ;;  %v893_v14 = vmax.f32 %v875_v53, 0.0  ;;  %v2137_v34 = vrot.slane %v426_v32, %v430_v16 }
 0x2d9   : > { %v896_v9 = vmax.f32 %v828_v60, 0.0  ;;  %v881_v11 = vadd.f32 %v880_v7, %v2098_v38  ;;  %v894_v19 = vmax.f32 %v877_v61, 0.0 }
 0x2da   : > { %v903_v13 = vpack.c.bf16 %v895_v2, %v891_v0  ;;  %v897_v17 = vmax.f32 %v879_v6, 0.0 }
 0x2db   : > { %v904_v18 = vpack.c.bf16 %v896_v9, %v892_v8  ;;  %v898_v20 = vmax.f32 %v881_v11, 0.0 }
 0x2dc   : > { %v905_v22 = vpack.c.bf16 %v897_v17, %v893_v14 }
 0x2dd   : > { %v906_v23 = vpack.c.bf16 %v898_v20, %v894_v19  ;;  %912 = vmatprep.subr.bf16.mxu0 %v904_v18 }
 0x2de   : > { %913 = vmatpush1.bf16.msra.mxu0 %v903_v13 }
 0x2df   : > { %953 = vmatprep.subr.bf16.mxu1 %v906_v23  ;;  %1058 = vmatprep.subr.bf16.mxu0 %v1050_v21 }
 0x2e0   : > { %954 = vmatpush1.bf16.msra.mxu1 %v905_v22 }
 0x2e1   : > { %1660 = vmatmul.mubr.msk.bf16.vlgmr.msra.gmra.mrb[24].mxu0 %vm624_vm3, %v2114_v25  ;;  %1111 = vmatprep.subr.bf16.mxu1 %v1056_v24 }
 0x2e2   : > { %1059 = vmatpush1.bf16.msra.mxu0 %v1047_v26  ;;  %1090 = vmatprep.mubr.bf16.mxu0 %v1802_v5 }
 0x2e3   : > { %1661 = vmatmul.mubr.msk.bf16.vlgmr.msra.gmra.mrb[24].mxu1 %vm624_vm3, %v2114_v25 }
 0x2e4   : > { %1112 = vmatpush1.bf16.msra.mxu1 %v1053_v27  ;;  %1143 = vmatprep.mubr.bf16.mxu1 %v1802_v5 }
 0x2e9   : > { %1663 = vmatmul.mubr.msk.bf16.vlgmr.msra.gmra.mrb[28].mxu0 %vm461_vm2, %v1956_v28 }
 0x2ea   : > { %1100 = vmatprep.mubr.bf16.mxu0 %v1802_v5 }
 0x2eb   : > { %1665 = vmatmul.mubr.msk.bf16.vlgmr.msra.gmra.mrb[28].mxu1 %vm461_vm2, %v1956_v28  ;;  %v1000_v28 = vunpack.c.0.s8 %v999_v31 }
 0x2ec   : > { %1153 = vmatprep.mubr.bf16.mxu1 %v1802_v5 }
 0x2ed   : > { %v2143_v51 = vsub.s32 %v1000_v28, %v1909_v4 }
 0x2f1   : > { %1664 = vmatmul.mubr.msk.bf16.gmra.mrb[32].mxu0 %vm461_vm2, %v1979_v33 }
 0x2f2   : > { %1220 = vmatprep.mubr.bf16.mxu0 %v1802_v5 }
 0x2f3   : > { %1666 = vmatmul.mubr.msk.bf16.gmra.mrb[32].mxu1 %vm461_vm2, %v1979_v33 }
 0x2f4   : > { %1273 = vmatprep.mubr.bf16.mxu1 %v1802_v5 }
 0x3b4   : > { %v944_v35 = vpop.f32.mrb[24].mxu0 }
 0x3b5   : > { %v945_v40 = vadd.f32 %v944_v35, %v2137_v34  ;;  %v946_v41 = vpop.f32.mrb[25].mxu0 }
 0x3b6   : > { %v947_v45 = vadd.f32 %v946_v41, %v2137_v34  ;;  %v948_v47 = vpop.f32.mrb[26].mxu0  ;;  %v985_v33 = vpop.f32.mrb[24].mxu1 }
 0x3b7   : > { %v986_v48 = vadd.f32 %v985_v33, %v2137_v34  ;;  %v949_v49 = vpop.f32.mrb[27].mxu0  ;;  %v987_v50 = vpop.f32.mrb[25].mxu1 }
 0x3b8   : > { %v996_v52 = vcombine.low %v945_v40, %v947_v45  ;;  %v988_v53 = vadd.f32 %v987_v50, %v2137_v34  ;;  %v989_v54 = vpop.f32.mrb[26].mxu1 }
 0x3b9   : > { %v990_v58 = vpop.f32.mrb[27].mxu1 }
 0x3ba   : > { %v997_v60 = vcombine.low %v986_v48, %v988_v53  ;;  %v1004_v61 = vrot.slane %v996_v52, %v2143_v51 }
 0x3bc   : > { %v1011_v62 = vrot.slane %v997_v60, %v2143_v51  ;;  %v1092_v63 = vpop.f32.mrb[28].mxu0 }
 0x3bd   : > { %v1093_v0 = vadd.f32 %v1092_v63, %v1990_v36  ;;  %v1094_v2 = vpop.f32.mrb[29].mxu0 }
 0x3be   : > { %v1012_v6 = vcombine.low %v1004_v61, %v1011_v62  ;;  %v1095_v4 = vadd.f32 %v1094_v2, %v1990_v36  ;;  %v1096_v7 = vpop.f32.mrb[30].mxu0  ;;  %v1145_v8 = vpop.f32.mrb[28].mxu1 }
 0x3bf   : > { %v1097_v9 = vadd.f32 %v1096_v7, %v1994_v39  ;;  %v1146_v11 = vadd.f32 %v1145_v8, %v1990_v36  ;;  %v1098_v12 = vpop.f32.mrb[31].mxu0  ;;  %v1147_v13 = vpop.f32.mrb[29].mxu1  ;;  %v1164_v21 = vmax.f32 %v1093_v0, 0.0 }
 0x3c0   : > { %v1019_v17 = vrot.slane %v1012_v6, %v2143_v51  ;;  %v1099_v18 = vadd.f32 %v1098_v12, %v1994_v39  ;;  %v1148_v19 = vadd.f32 %v1147_v13, %v1990_v36  ;;  %v1149_v20 = vpop.f32.mrb[30].mxu1  ;;  %v1165_v26 = vmax.f32 %v1095_v4, 0.0 }
 0x3c1   : > { %v1168_v22 = vmax.f32 %v1097_v9, 0.0  ;;  %v1150_v23 = vadd.f32 %v1149_v20, %v1994_v39  ;;  %v1151_v24 = vpop.f32.mrb[31].mxu1  ;;  %v1166_v30 = vmax.f32 %v1146_v11, 0.0 }
 0x3c2   : > { %v1169_v27 = vmax.f32 %v1099_v18, 0.0  ;;  %v1152_v16 = vadd.f32 %v1151_v24, %v1994_v39  ;;  %1025 = vst.msk [vmem:[%s2165_s29] sm:$0xf] %vm2156_vm4, %v1019_v17  ;;  %v1167_v32 = vmax.f32 %v1148_v19, 0.0 }
 0x3c3   : > { %v1180_v1 = vpack.c.bf16 %v1168_v22, %v1164_v21  ;;  %v1170_v31 = vmax.f32 %v1150_v23, 0.0 }
 0x3c4   : > { %v1181_v36 = vpack.c.bf16 %v1169_v27, %v1165_v26  ;;  %v1171_v28 = vmax.f32 %v1152_v16, 0.0  ;;  %v1102_v35 = vpop.f32.mrb[32].mxu0 }
 0x3c5   : > { %v1182_v40 = vpack.c.bf16 %v1170_v31, %v1166_v30  ;;  %v1103_v41 = vadd.f32 %v1102_v35, %v1992_v37  ;;  %v1104_v45 = vpop.f32.mrb[33].mxu0 }
 0x3c6   : > { %v1183_v47 = vpack.c.bf16 %v1171_v28, %v1167_v32  ;;  %v1105_v39 = vadd.f32 %v1104_v45, %v1992_v37  ;;  %v1106_v33 = vpop.f32.mrb[34].mxu0  ;;  %v1155_v48 = vpop.f32.mrb[32].mxu1  ;;  %1188 = vmatprep.subr.bf16.mxu0 %v1181_v36 }
 0x3c7   : > { %v1107_v49 = vadd.f32 %v1106_v33, %v2004_v3  ;;  %v1156_v50 = vadd.f32 %v1155_v48, %v1992_v37  ;;  %v1108_v52 = vpop.f32.mrb[35].mxu0  ;;  %v1157_v53 = vpop.f32.mrb[33].mxu1  ;;  %1189 = vmatpush1.bf16.msra.mxu0 %v1180_v1  ;;  %v1172_v61 = vmax.f32 %v1103_v41, 0.0 }
 0x3c8   : > { %v1109_v54 = vadd.f32 %v1108_v52, %v2004_v3  ;;  %v1158_v58 = vadd.f32 %v1157_v53, %v1992_v37  ;;  %v1159_v60 = vpop.f32.mrb[34].mxu1  ;;  %1241 = vmatprep.subr.bf16.mxu1 %v1183_v47  ;;  %v1173_v2 = vmax.f32 %v1105_v39, 0.0 }
 0x3c9   : > { %v1176_v62 = vmax.f32 %v1107_v49, 0.0  ;;  %v1160_v63 = vadd.f32 %v1159_v60, %v2004_v3  ;;  %v1161_v0 = vpop.f32.mrb[35].mxu1  ;;  %1242 = vmatpush1.bf16.msra.mxu1 %v1182_v40  ;;  %v1174_v8 = vmax.f32 %v1156_v50, 0.0 }
 0x3ca   : > { %v1177_v6 = vmax.f32 %v1109_v54, 0.0  ;;  %v1162_v4 = vadd.f32 %v1161_v0, %v2004_v3  ;;  %v1175_v12 = vmax.f32 %v1158_v58, 0.0 }
 0x3cb   : > { %v1184_v7 = vpack.c.bf16 %v1176_v62, %v1172_v61  ;;  %v1178_v9 = vmax.f32 %v1160_v63, 0.0 }
 0x3cc   : > { %v1185_v11 = vpack.c.bf16 %v1177_v6, %v1173_v2  ;;  %v1179_v13 = vmax.f32 %v1162_v4, 0.0 }
 0x3cd   : > { %v1186_v17 = vpack.c.bf16 %v1178_v9, %v1174_v8 }
 0x3ce   : > { %v1187_v37 = vpack.c.bf16 %v1179_v13, %v1175_v12  ;;  %1190 = vmatprep.subr.bf16.mxu0 %v1185_v11 }
 0x3cf   : > { %1191 = vmatpush1.bf16.msra.mxu0 %v1184_v7 }
 0x3d0   : > { %1243 = vmatprep.subr.bf16.mxu1 %v1187_v37 }
 0x3d1   : > { %1244 = vmatpush1.bf16.msra.mxu1 %v1186_v17 }
 0x3d2   : > { %1667 = vmatmul.mubr.msk.bf16.vlgmr.msra.gmra.mrb[36].mxu0 %vm624_vm3, %v2017_v42 }
 0x3d3   : > { %1230 = vmatprep.mubr.bf16.mxu0 %v1802_v5 }
 0x3d4   : > { %1669 = vmatmul.mubr.msk.bf16.vlgmr.msra.gmra.mrb[36].mxu1 %vm624_vm3, %v2017_v42 }
 0x3d5   : > { %1283 = vmatprep.mubr.bf16.mxu1 %v1802_v5 }
 0x3da   : > { %1668 = vmatmul.mubr.msk.bf16.gmra.mrb[40].mxu0 %vm624_vm3, %v2028_v43 }
 0x3db   : > { %1350 = vmatprep.mubr.bf16.mxu0 %v1802_v5 }
 0x3dc   : > { %1670 = vmatmul.mubr.msk.bf16.gmra.mrb[40].mxu1 %vm624_vm3, %v2028_v43 }
 0x3dd   : > { %1403 = vmatprep.mubr.bf16.mxu1 %v1802_v5 }
 0x4a5   : > { %v1222_v3 = vpop.f32.mrb[36].mxu0 }
 0x4a6   : > { %v1223_v18 = vadd.f32 %v1222_v3, %v2036_v44  ;;  %v1224_v19 = vpop.f32.mrb[37].mxu0 }
 0x4a7   : > { %v1225_v20 = vadd.f32 %v1224_v19, %v2036_v44  ;;  %v1226_v21 = vpop.f32.mrb[38].mxu0  ;;  %v1275_v42 = vpop.f32.mrb[36].mxu1 }
 0x4a8   : > { %v1227_v22 = vadd.f32 %v1226_v21, %v2038_v46  ;;  %v1276_v23 = vadd.f32 %v1275_v42, %v2036_v44  ;;  %v1228_v24 = vpop.f32.mrb[39].mxu0  ;;  %v1277_v26 = vpop.f32.mrb[37].mxu1  ;;  %v1294_v1 = vmax.f32 %v1223_v18, 0.0 }
 0x4a9   : > { %v1229_v27 = vadd.f32 %v1228_v24, %v2038_v46  ;;  %v1278_v43 = vadd.f32 %v1277_v26, %v2036_v44  ;;  %v1279_v16 = vpop.f32.mrb[38].mxu1  ;;  %v1295_v32 = vmax.f32 %v1225_v20, 0.0 }
 0x4aa   : > { %v1298_v30 = vmax.f32 %v1227_v22, 0.0  ;;  %v1280_v31 = vadd.f32 %v1279_v16, %v2038_v46  ;;  %v1281_v36 = vpop.f32.mrb[39].mxu1  ;;  %v1296_v41 = vmax.f32 %v1276_v23, 0.0 }
 0x4ab   : > { %v1299_v28 = vmax.f32 %v1229_v27, 0.0  ;;  %v1282_v35 = vadd.f32 %v1281_v36, %v2038_v46  ;;  %v1297_v39 = vmax.f32 %v1278_v43, 0.0 }
 0x4ac   : > { %v1310_v40 = vpack.c.bf16 %v1298_v30, %v1294_v1  ;;  %v1300_v45 = vmax.f32 %v1280_v31, 0.0 }
 0x4ad   : > { %v1311_v47 = vpack.c.bf16 %v1299_v28, %v1295_v32  ;;  %v1301_v33 = vmax.f32 %v1282_v35, 0.0  ;;  %v1232_v48 = vpop.f32.mrb[40].mxu0 }
 0x4ae   : > { %v1312_v49 = vpack.c.bf16 %v1300_v45, %v1296_v41  ;;  %v1233_v44 = vadd.f32 %v1232_v48, %v2048_v10  ;;  %v1234_v50 = vpop.f32.mrb[41].mxu0 }
 0x4af   : > { %v1313_v52 = vpack.c.bf16 %v1301_v33, %v1297_v39  ;;  %v1235_v53 = vadd.f32 %v1234_v50, %v2048_v10  ;;  %v1236_v54 = vpop.f32.mrb[42].mxu0  ;;  %v1285_v58 = vpop.f32.mrb[40].mxu1  ;;  %1318 = vmatprep.subr.bf16.mxu0 %v1311_v47 }
 0x4b0   : > { %v1237_v60 = vadd.f32 %v1236_v54, %v2050_v15  ;;  %v1286_v46 = vadd.f32 %v1285_v58, %v2048_v10  ;;  %v1238_v61 = vpop.f32.mrb[43].mxu0  ;;  %v1287_v62 = vpop.f32.mrb[41].mxu1  ;;  %1319 = vmatpush1.bf16.msra.mxu0 %v1310_v40  ;;  %v1302_v6 = vmax.f32 %v1233_v44, 0.0 }
 0x4b1   : > { %v1239_v63 = vadd.f32 %v1238_v61, %v2050_v15  ;;  %v1288_v0 = vadd.f32 %v1287_v62, %v2048_v10  ;;  %v1289_v2 = vpop.f32.mrb[42].mxu1  ;;  %1371 = vmatprep.subr.bf16.mxu1 %v1313_v52  ;;  %v1303_v9 = vmax.f32 %v1235_v53, 0.0 }
 0x4b2   : > { %v1306_v4 = vmax.f32 %v1237_v60, 0.0  ;;  %v1290_v7 = vadd.f32 %v1289_v2, %v2050_v15  ;;  %v1291_v8 = vpop.f32.mrb[43].mxu1  ;;  %1372 = vmatpush1.bf16.msra.mxu1 %v1312_v49  ;;  %v1304_v17 = vmax.f32 %v1286_v46, 0.0 }
 0x4b3   : > { %v1307_v11 = vmax.f32 %v1239_v63, 0.0  ;;  %v1292_v12 = vadd.f32 %v1291_v8, %v2050_v15  ;;  %v1305_v18 = vmax.f32 %v1288_v0, 0.0 }
 0x4b4   : > { %v1314_v13 = vpack.c.bf16 %v1306_v4, %v1302_v6  ;;  %v1308_v37 = vmax.f32 %v1290_v7, 0.0 }
 0x4b5   : > { %v1315_v3 = vpack.c.bf16 %v1307_v11, %v1303_v9  ;;  %v1309_v19 = vmax.f32 %v1292_v12, 0.0 }
 0x4b6   : > { %v1316_v20 = vpack.c.bf16 %v1308_v37, %v1304_v17 }
 0x4b7   : > { %v1317_v10 = vpack.c.bf16 %v1309_v19, %v1305_v18  ;;  %1320 = vmatprep.subr.bf16.mxu0 %v1315_v3 }
 0x4b8   : > { %1321 = vmatpush1.bf16.msra.mxu0 %v1314_v13 }
 0x4b9   : > { %1373 = vmatprep.subr.bf16.mxu1 %v1317_v10 }
 0x4ba   : > { %1374 = vmatpush1.bf16.msra.mxu1 %v1316_v20 }
 0x4bb   : > { %1671 = vmatmul.mubr.msk.bf16.vlgmr.msra.gmra.mrb[44].mxu0 %vm624_vm3, %v2063_v55 }
 0x4bc   : > { %1360 = vmatprep.mubr.bf16.mxu0 %v1802_v5 }
 0x4bd   : > { %1673 = vmatmul.mubr.msk.bf16.vlgmr.msra.gmra.mrb[44].mxu1 %vm624_vm3, %v2063_v55 }
 0x4be   : > { %1413 = vmatprep.mubr.bf16.mxu1 %v1802_v5 }
 0x4c3   : > { %1672 = vmatmul.mubr.msk.bf16.gmra.mrb[48].mxu0 %vm624_vm3, %v2074_v56 }
 0x4c4   : > { %1480 = vmatprep.mubr.bf16.mxu0 %v1802_v5 }
 0x4c5   : > { %1674 = vmatmul.mubr.msk.bf16.gmra.mrb[48].mxu1 %vm624_vm3, %v2074_v56 }
 0x4c6   : > { %1521 = vmatprep.mubr.bf16.mxu1 %v1802_v5 }
 0x58e   : > { %v1352_v15 = vpop.f32.mrb[44].mxu0 }
 0x58f   : > { %v1353_v21 = vadd.f32 %v1352_v15, %v2082_v57  ;;  %v1354_v42 = vpop.f32.mrb[45].mxu0 }
 0x590   : > { %v1355_v22 = vadd.f32 %v1354_v42, %v2082_v57  ;;  %v1356_v23 = vpop.f32.mrb[46].mxu0  ;;  %v1405_v55 = vpop.f32.mrb[44].mxu1 }
 0x591   : > { %v1357_v24 = vadd.f32 %v1356_v23, %v2084_v59  ;;  %v1406_v26 = vadd.f32 %v1405_v55, %v2082_v57  ;;  %v1358_v27 = vpop.f32.mrb[47].mxu0  ;;  %v1407_v43 = vpop.f32.mrb[45].mxu1  ;;  %v1424_v5 = vmax.f32 %v1353_v21, 0.0 }
 0x592   : > { %v1359_v16 = vadd.f32 %v1358_v27, %v2084_v59  ;;  %v1408_v56 = vadd.f32 %v1407_v43, %v2082_v57  ;;  %v1409_v1 = vpop.f32.mrb[46].mxu1  ;;  %v1425_v32 = vmax.f32 %v1355_v22, 0.0 }
 0x593   : > { %v1428_v30 = vmax.f32 %v1357_v24, 0.0  ;;  %v1410_v31 = vadd.f32 %v1409_v1, %v2084_v59  ;;  %v1411_v36 = vpop.f32.mrb[47].mxu1  ;;  %v1426_v41 = vmax.f32 %v1406_v26, 0.0 }
 0x594   : > { %v1429_v28 = vmax.f32 %v1359_v16, 0.0  ;;  %v1412_v35 = vadd.f32 %v1411_v36, %v2084_v59  ;;  %v1427_v39 = vmax.f32 %v1408_v56, 0.0 }
 0x595   : > { %v1440_v40 = vpack.c.bf16 %v1428_v30, %v1424_v5  ;;  %v1430_v45 = vmax.f32 %v1410_v31, 0.0 }
 0x596   : > { %v1441_v47 = vpack.c.bf16 %v1429_v28, %v1425_v32  ;;  %v1431_v33 = vmax.f32 %v1412_v35, 0.0  ;;  %v1362_v48 = vpop.f32.mrb[48].mxu0 }
 0x597   : > { %v1442_v49 = vpack.c.bf16 %v1430_v45, %v1426_v41  ;;  %v1363_v57 = vadd.f32 %v1362_v48, %v2095_v29  ;;  %v1364_v44 = vpop.f32.mrb[49].mxu0 }
 0x598   : > { %v1443_v50 = vpack.c.bf16 %v1431_v33, %v1427_v39  ;;  %v1365_v52 = vadd.f32 %v1364_v44, %v2095_v29  ;;  %v1366_v53 = vpop.f32.mrb[50].mxu0  ;;  %v1415_v54 = vpop.f32.mrb[48].mxu1  ;;  %1448 = vmatprep.subr.bf16.mxu0 %v1441_v47 }
 0x599   : > { %v1367_v58 = vadd.f32 %v1366_v53, %v2098_v38  ;;  %v1416_v59 = vadd.f32 %v1415_v54, %v2095_v29  ;;  %v1368_v60 = vpop.f32.mrb[51].mxu0  ;;  %v1417_v46 = vpop.f32.mrb[49].mxu1  ;;  %1449 = vmatpush1.bf16.msra.mxu0 %v1440_v40  ;;  %v1432_v0 = vmax.f32 %v1363_v57, 0.0 }
 0x59a   : > { %v1369_v61 = vadd.f32 %v1368_v60, %v2098_v38  ;;  %v1418_v62 = vadd.f32 %v1417_v46, %v2095_v29  ;;  %v1419_v63 = vpop.f32.mrb[50].mxu1  ;;  %1489 = vmatprep.subr.bf16.mxu1 %v1443_v50  ;;  %v1433_v7 = vmax.f32 %v1365_v52, 0.0 }
 0x59b   : > { %v1436_v2 = vmax.f32 %v1367_v58, 0.0  ;;  %v1420_v6 = vadd.f32 %v1419_v63, %v2098_v38  ;;  %v1421_v4 = vpop.f32.mrb[51].mxu1  ;;  %1490 = vmatpush1.bf16.msra.mxu1 %v1442_v49  ;;  %v1434_v12 = vmax.f32 %v1416_v59, 0.0 }
 0x59c   : > { %v1437_v8 = vmax.f32 %v1369_v61, 0.0  ;;  %v1422_v9 = vadd.f32 %v1421_v4, %v2098_v38  ;;  %v1435_v37 = vmax.f32 %v1418_v62, 0.0 }
 0x59d   : > { %v1444_v11 = vpack.c.bf16 %v1436_v2, %v1432_v0  ;;  %v1438_v13 = vmax.f32 %v1420_v6, 0.0 }
 0x59e   : > { %v1445_v17 = vpack.c.bf16 %v1437_v8, %v1433_v7  ;;  %v1439_v3 = vmax.f32 %v1422_v9, 0.0 }
 0x59f   : > { %v1446_v18 = vpack.c.bf16 %v1438_v13, %v1434_v12 }
 0x5a0   : > { %v1447_v29 = vpack.c.bf16 %v1439_v3, %v1435_v37  ;;  %1450 = vmatprep.subr.bf16.mxu0 %v1445_v17 }
 0x5a1   : > { %1451 = vmatpush1.bf16.msra.mxu0 %v1444_v11 }
 0x5a2   : > { %1491 = vmatprep.subr.bf16.mxu1 %v1447_v29 }
 0x5a3   : > { %1492 = vmatpush1.bf16.msra.mxu1 %v1446_v18 }
 0x5a4   : > { %1675 = vmatmul.mubr.msk.bf16.vlgmr.msra.gmra.mrb[52].mxu0 %vm624_vm3, %v2114_v25 }
 0x5a6   : > { %1676 = vmatmul.mubr.msk.bf16.vlgmr.msra.gmra.mrb[52].mxu1 %vm624_vm3, %v2114_v25 }
 0x677   : > { %v1482_v19 = vpop.f32.mrb[52].mxu0 }
 0x678   : > { %v1483_v38 = vadd.f32 %v1482_v19, %v2137_v34  ;;  %v1484_v20 = vpop.f32.mrb[53].mxu0 }
 0x679   : > { %v1485_v10 = vadd.f32 %v1484_v20, %v2137_v34  ;;  %v1523_v15 = vpop.f32.mrb[52].mxu1  ;;  %v1486_v21 = vpop.f32.mrb[54].mxu0 }
 0x67a   : > { %v1524_v42 = vadd.f32 %v1523_v15, %v2137_v34  ;;  %v1525_v22 = vpop.f32.mrb[53].mxu1  ;;  %v1487_v23 = vpop.f32.mrb[55].mxu0 }
 0x67b   : > { %v1534_v55 = vcombine.low %v1483_v38, %v1485_v10  ;;  %v1526_v24 = vadd.f32 %v1525_v22, %v2137_v34  ;;  %v1527_v25 = vpop.f32.mrb[54].mxu1 }
 0x67c   : > { %v1528_v26 = vpop.f32.mrb[55].mxu1 }
 0x67d   : > { %v1535_v27 = vcombine.low %v1524_v42, %v1526_v24  ;;  %v1542_v43 = vrot.slane %v1534_v55, %v2143_v51 }
 0x67f   : > { %v1549_v16 = vrot.slane %v1535_v27, %v2143_v51 }
 0x681   : > { %v1550_v56 = vcombine.low %v1542_v43, %v1549_v16 }
 0x683   : > { %v1557_v1 = vrot.slane %v1550_v56, %v2143_v51 }
 0x685   : > { %1677 = vst.msk [vmem:[%s2165_s29 + $0x4] sm:$0xf] %vm2156_vm4, %v1557_v1 }
 0x686   : > { %1750 = shalt.err (!%p1747_p3)
}
 0x687   : > { %s1751_s26 = scalar_lea.hbm %s2250_s22, 128  ;;  %s1755_s29 = scalar_lea.hbm %s2306_s9, 256 }
 0x688   : > { %p1752_p4 = scmp.ne.s32.totalorder %s2250_s22, %s1751_s26  ;;  %p1756_p9 = scmp.lt.u32.totalorder %s2250_s22, %s2306_s9 }
 0x689   : > { %p1757_p10 = scmp.lt.u32.totalorder %s1755_s29, %s1751_s26  ;;  %p1759_p12 = scmp.lt.u32.totalorder %s1751_s26, %s2250_s22 }
 0x68a   : > { %p1753_p7 = pnand %p1752_p4, %p1897_p5 }
 0x68b   : > { %p1758_p11 = por %p1757_p10, %p1756_p9 }
 0x68c   : > { %p1754_p8 = pneg %p1753_p7 }
 0x68d   : > { %p1760_p13 = por %p1759_p12, %p1758_p11 }
 0x68f   : > { %p1761_p0 = pnand %p1760_p13, %p1754_p8 }
 0x691   : > { %1764 = shalt.err (!%p1761_p0)
}
 0x692   : > { %1684 = dma.vmem_to_hbm [thread:$0]  (%p1897_p5), %s2252_s10, 128, %s2250_s22, %s1562_s23  }
 0x693 PF: > { %p1690_p1 = scmp.ge.s32.totalorder %s1799_s14, 2  ;;  %s1588_s18 = sand.u32 1, %s1787_s11  }
 0x694   : > { %s1589_s8 = scalar_lea.sflag [#allocation4], %s1588_s18 }
 0x695   : > { %p1687_p2 = pnand %p1690_p1, %p1901_p6 }
 0x697   : > { %1782 = dma.done.wait (!%p1687_p2), %s1589_s8, 128  }
 0x698   : > { %1784 = vsyncadd (!%p1687_p2), %s1589_s8, 4294967168  ;;  %p21_p3 = scmp.ge.s32.totalorder %s1884_s16, 4   ;;  %s2311_s11 = smov %s1791_s12 }
 0x699   : > { %s2312_s12 = smov %s1795_s13  ;;  %s2313_s13 = smov %s1895_s19 }
 0x69a   : > { %s2314_s14 = smov %s1884_s16  ;;  %23 = sbr.rel (!%p21_p3) target bundleno = 6 (0x6), region = 93 }
 0x6a1   :  { %1594 = vsyncpa [#allocation4], 1 }
 0x6a2   :  { %1596 = vsyncpa [#allocation4 + $0x1], 1 }

</bundles_post_ra>
